<compile_context>
chip_gen: v5e
topology: v5e:2x2
jax: 0.10.0
libtpu: 0.0.40
codegen_flags: <defaults>
</compile_context>

<pallas_src>
import math

import jax
import jax.numpy as jnp
from jax.experimental import pallas as pl
from jax.experimental.pallas import tpu as pltpu


_LANE = 128
_SUBLANE_MIN = 8                      # hard minimum second-minor block alignment
# Per-grid-step live pipelined block budget: x & out double-buffered, pe
# double-buffered.  ~24 MiB -> ~4 MiB per block (v7x-friendly) while leaving
# ample headroom under v7x's 64 MiB physical VMEM; same tiles serve v5e/v6e.
_BLOCK_BUDGET_BYTES = 24 * 1024 * 1024
_VMEM_LIMIT_CAP_BYTES = 48 * 1024 * 1024
_VMEM_LIMIT_FLOOR_BYTES = 8 * 1024 * 1024


def _build_pe(d_model: int, max_len: int = 5000, dtype=jnp.float32) -> jnp.ndarray:
    """Sinusoidal positional-encoding table, (1, max_len, d_model).

    Built once like the PyTorch registered buffer (fp32 by default).  Also guards
    odd d_model (cos half gets floor(D/2) columns), which the PyTorch original
    does not.
    """
    position = jnp.arange(max_len, dtype=jnp.float32)[:, None]               # (L, 1)
    div_term = jnp.exp(
        jnp.arange(0, d_model, 2, dtype=jnp.float32)
        * (-math.log(10000.0) / d_model)
    )                                                                         # (ceil(D/2),)
    angles = position * div_term                                              # (L, ceil(D/2))
    pe = jnp.zeros((max_len, d_model), dtype=jnp.float32)
    pe = pe.at[:, 0::2].set(jnp.sin(angles))
    pe = pe.at[:, 1::2].set(jnp.cos(angles[:, : d_model // 2]))
    return pe[None, :, :].astype(dtype)                                       # (1, L, D)


def _add_pe_kernel(x_ref, pe_ref, o_ref):
    # x_ref / pe_ref / o_ref are identical 2-D tiles.  The add is done in f32
    # (PyTorch keeps pe in fp32, so bf16 activations promote) and cast once to
    # the output dtype; the casts are free VPU filler in this mem-bound kernel.
    acc = x_ref[...].astype(jnp.float32) + pe_ref[...].astype(jnp.float32)
    o_ref[...] = acc.astype(o_ref.dtype)


def _sublane_align(itemsize: int) -> int:
    # dtype-aware sublane packing: 8 rows/vreg for f32, 16 for bf16, 32 for int8.
    return max(_SUBLANE_MIN, 32 // max(1, itemsize))


def _pick_tile_rows(total_rows: int, row_bytes: int, align: int, budget: int) -> int:
    """Largest tile (in rows) whose live pipelined blocks fit `budget`.

    Returns the full extent when everything fits in one tile; otherwise an
    `align`-aligned tile (>= 8 rows), used with a cdiv/ragged grid so no
    "divides evenly" requirement and no untiled-fallback VMEM hazard.
    """
    budget_rows = max(1, budget // row_bytes)
    if budget_rows >= total_rows:
        return total_rows
    t = (budget_rows // align) * align
    if t == 0:
        # pathological row width (enormous D): smallest legal aligned tile
        t = min(total_rows, align)
    return t


def positional_encoding_forward(x: jnp.ndarray, pe: jnp.ndarray, *,
                                donate_x: bool = False,
                                block_budget_bytes: int = _BLOCK_BUDGET_BYTES,
                                ) -> jnp.ndarray:
    """x: (B, S, D); pe: (1, max_len, D) registered table. Returns x + pe[:, :S]."""
    B, S, D = x.shape
    one, max_len, d_pe = pe.shape
    assert one == 1 and d_pe == D and S <= max_len

    x_item = jnp.dtype(x.dtype).itemsize
    pe_item = jnp.dtype(pe.dtype).itemsize
    align = _sublane_align(x_item)

    # Lane-dense trick: if d_model is not a multiple of 128, fold (S, D) into
    # dense (rows, 128) blocks so output stores are unmasked and vregs / VMEM
    # tiles are fully packed.  These reshapes only merge contiguous trailing
    # dims, so with the default row-major layout they are bitcasts, not copies.
    lane_flat = (D % _LANE != 0) and (S * D) % _LANE == 0 and (max_len * D) % _LANE == 0

    if lane_flat:
        rows_x = S * D // _LANE
        row_bytes = (4 * x_item + 2 * pe_item) * _LANE
        t_rows = _pick_tile_rows(rows_x, row_bytes, align, block_budget_bytes)
        num_s = pl.cdiv(rows_x, t_rows)
        if num_s == 1 and rows_x % _SUBLANE_MIN != 0:
            # Single-tile case with an unaligned row count: slice the used prefix
            # of pe so its block equals its full extent (block-shape legality).
            # The copy is S*D elements -- negligible next to the 2*B*S*D traffic.
            pe_in = pe[:, :S, :].reshape(1, rows_x, _LANE)
        else:
            pe_in = pe.reshape(1, max_len * D // _LANE, _LANE)
        x_in = x.reshape(B, rows_x, _LANE)
        blk = (pl.Squeezed(), t_rows, _LANE)
        tile_elems = t_rows * _LANE
    else:
        row_bytes = (4 * x_item + 2 * pe_item) * D
        t_rows = _pick_tile_rows(S, row_bytes, align, block_budget_bytes)
        num_s = pl.cdiv(S, t_rows)
        if num_s == 1 and S % _SUBLANE_MIN != 0:
            pe_in = pe[:, :S, :]       # same legality edge case as above
        else:
            pe_in = pe
        x_in = x
        blk = (pl.Squeezed(), t_rows, D)
        tile_elems = t_rows * D

    # Grid: sequence tiles outermost, batch innermost, so the pe block index is
    # constant across consecutive batch steps and its DMA is elided.  When there
    # is a single sequence tile, collapse to a 1-D batch grid so the leading
    # parallel extent is B (keeps both v7x TensorCores busy on short-sequence /
    # large-batch shapes; no effect on single-TC v5e/v6e).
    if num_s == 1:
        grid = (B,)
        x_idx = lambda b: (b, 0, 0)
        pe_idx = lambda b: (0, 0, 0)
        dims = ("parallel",)
    else:
        grid = (num_s, B)
        x_idx = lambda s, b: (b, s, 0)
        pe_idx = lambda s, b: (0, s, 0)
        dims = ("parallel", "parallel")

    x_spec = pl.BlockSpec(blk, x_idx)
    pe_spec = pl.BlockSpec(blk, pe_idx)
    out_spec = pl.BlockSpec(blk, x_idx)

    # Scoped-VMEM request close to actual pipeline usage (2 buffers per operand)
    # rather than a blanket maximum: tight on v5e (doesn't starve neighbouring
    # fusions), generous enough on v7x, capped well under 64 MiB physical.
    used_bytes = 2 * tile_elems * (2 * x_item + pe_item)
    vmem_limit = int(min(_VMEM_LIMIT_CAP_BYTES,
                         max(_VMEM_LIMIT_FLOOR_BYTES, 2 * used_bytes)))

    cost = pl.CostEstimate(
        flops=B * S * D,
        transcendentals=0,
        bytes_accessed=2 * B * S * D * x_item + S * D * pe_item,
    )

    # TODO(synk): optional variant that computes the sinusoid in-kernel on the EUP
    # (broadcasted_iota + exp/sin/cos) would remove the pe HBM read entirely; kept
    # table-based here for exact parity with the registered buffer.
    out = pl.pallas_call(
        _add_pe_kernel,
        out_shape=jax.ShapeDtypeStruct(x_in.shape, x.dtype),
        grid_spec=pltpu.PrefetchScalarGridSpec(
            num_scalar_prefetch=0,
            grid=grid,
            in_specs=[x_spec, pe_spec],
            out_specs=out_spec,
        ),
        compiler_params=pltpu.CompilerParams(
            dimension_semantics=dims,
            vmem_limit_bytes=vmem_limit,
        ),
        cost_estimate=cost,
        # Alias x to the output when the caller is done with x; removes a full
        # (B, S, D) HBM allocation at the call boundary (recommended in training
        # loops where the pre-encoding activations are dead).
        input_output_aliases={0: 0} if donate_x else {},
    )(x_in, pe_in)

    return out.reshape(B, S, D) if lane_flat else out


if __name__ == "__main__":
    key = jax.random.PRNGKey(0)
    k1, k2, k3 = jax.random.split(key, 3)
    MAX_LEN = 64  # module default is 5000; only the first S rows are used

    # Case 1: narrow d_model (< 128) -> lane-dense flattened path, 1-D batch grid.
    B, S, D = 2, 8, 32
    x = jax.random.normal(k1, (B, S, D), dtype=jnp.float32)
    pe = _build_pe(D, MAX_LEN)
    out = jax.block_until_ready(positional_encoding_forward(x, pe))
    ref = x + pe[:, :S, :]
    assert out.shape == (B, S, D)
    assert jnp.allclose(out, ref, atol=1e-6), "mismatch vs reference (narrow-D path)"

    # Case 2: lane-aligned d_model (multiple of 128) -> natural (tS, D) path.
    B2, S2, D2 = 3, 16, 128
    x2 = jax.random.normal(k2, (B2, S2, D2), dtype=jnp.float32)
    pe2 = _build_pe(D2, MAX_LEN)
    out2 = jax.block_until_ready(positional_encoding_forward(x2, pe2))
    ref2 = x2 + pe2[:, :S2, :]
    assert out2.shape == (B2, S2, D2)
    assert jnp.allclose(out2, ref2, atol=1e-6), "mismatch vs reference (aligned path)"

    # Case 3: force multi-tile + ragged last block (tiny budget) to exercise the
    # (num_s, B) grid, cdiv tiling, and the pe-DMA-elision ordering.
    B3, S3, D3 = 2, 20, 128
    x3 = jax.random.normal(k3, (B3, S3, D3), dtype=jnp.float32)
    pe3 = _build_pe(D3, MAX_LEN)
    tiny_budget = (4 * 4 + 2 * 4) * D3 * 8   # -> 8-row tiles, 3 ragged S-tiles
    out3 = jax.block_until_ready(
        positional_encoding_forward(x3, pe3, block_budget_bytes=tiny_budget))
    ref3 = x3 + pe3[:, :S3, :]
    assert out3.shape == (B3, S3, D3)
    assert jnp.allclose(out3, ref3, atol=1e-6), "mismatch vs reference (ragged tiled path)"

    print("KERNEL_OK")
</pallas_src>

<mosaic_0001>
module attributes {stable_mosaic.version = 11 : i64} {
  func.func @_add_pe_kernel(%arg0: i32, %arg1: memref<1x2x128xf32, #tpu.memory_space<vmem>>, %arg2: memref<1x2x128xf32, #tpu.memory_space<vmem>>, %arg3: memref<1x2x128xf32, #tpu.memory_space<vmem>>) attributes {dimension_semantics = [#tpu.dimension_semantics<parallel>], iteration_bounds = array<i64: 2>, scalar_prefetch = 0 : i64, scratch_operands = 0 : i64, tpu.core_type = #tpu.core_type<tc>, window_params = [{transform_indices = @transform_0, window_bounds = array<i64: 1, 2, 128>}, {pipeline_mode = #tpu.pipeline_mode<synchronous>, transform_indices = @transform_1, window_bounds = array<i64: 1, 2, 128>}, {transform_indices = @transform_2, window_bounds = array<i64: 1, 2, 128>}]} {
    %c0 = arith.constant 0 : index
    %c0_0 = arith.constant 0 : index
    %c0_1 = arith.constant 0 : index
    %0 = vector.load %arg1[%c0, %c0_0, %c0_1] : memref<1x2x128xf32, #tpu.memory_space<vmem>>, vector<1x2x128xf32>
    %1 = vector.shape_cast %0 : vector<1x2x128xf32> to vector<2x128xf32>
    %c0_2 = arith.constant 0 : index
    %c0_3 = arith.constant 0 : index
    %c0_4 = arith.constant 0 : index
    %2 = vector.load %arg2[%c0_2, %c0_3, %c0_4] : memref<1x2x128xf32, #tpu.memory_space<vmem>>, vector<1x2x128xf32>
    %3 = vector.shape_cast %2 : vector<1x2x128xf32> to vector<2x128xf32>
    %4 = arith.addf %1, %3 : vector<2x128xf32>
    %c0_5 = arith.constant 0 : index
    %c0_6 = arith.constant 0 : index
    %c0_7 = arith.constant 0 : index
    %5 = vector.load %arg3[%c0_5, %c0_6, %c0_7] : memref<1x2x128xf32, #tpu.memory_space<vmem>>, vector<1x2x128xf32>
    %6 = vector.shape_cast %5 : vector<1x2x128xf32> to vector<2x128xf32>
    %7 = vector.shape_cast %4 : vector<2x128xf32> to vector<1x2x128xf32>
    tpu.vector_store %arg3[%c0_5, %c0_6, %c0_7], %7 {strides = array<i32>} : memref<1x2x128xf32, #tpu.memory_space<vmem>>, vector<1x2x128xf32>,
    return
  }
  func.func @transform_0(%arg0: i32) -> (i32, i32, i32) {
    %c0_i32 = arith.constant 0 : i32
    %c0_i32_0 = arith.constant 0 : i32
    %c0_i32_1 = arith.constant 0 : i32
    return %arg0, %c0_i32, %c0_i32_0 : i32, i32, i32
  }
  func.func @transform_1(%arg0: i32) -> (i32, i32, i32) {
    %c0_i32 = arith.constant 0 : i32
    %c0_i32_0 = arith.constant 0 : i32
    %c0_i32_1 = arith.constant 0 : i32
    %c0_i32_2 = arith.constant 0 : i32
    return %c0_i32, %c0_i32_0, %c0_i32_1 : i32, i32, i32
  }
  func.func @transform_2(%arg0: i32) -> (i32, i32, i32) {
    %c0_i32 = arith.constant 0 : i32
    %c0_i32_0 = arith.constant 0 : i32
    %c0_i32_1 = arith.constant 0 : i32
    return %arg0, %c0_i32, %c0_i32_0 : i32, i32, i32
  }
}

</mosaic_0001>

<bundles_post_ra>
// kernel: tpu_custom_call.1
= control target key start
LH: loop header
LB: loop body
LE: loop exit
PB: predicated region body
PF: predicated region fallthrough
CT: control target
= control target key end

     0   :  { %7 = vsyncpa [#allocation3], 0  ;;  %s633_s0 = inlined_call_operand.hbm [shape: f32[2,2,128], index: 0, kind: input, shape index: {}]   ;;  %s634_s1 = inlined_call_operand.hbm [shape: f32[1,2,128], index: 1, kind: input, shape index: {}]   ;;  %s635_s2 = inlined_call_operand.hbm [shape: f32[2,2,128], index: 2, kind: output, shape index: {}]  }
   0x1   :  { %9 = vsyncpa [#allocation3 + $0x1], 0 }
   0x2   :  { %10 = vsyncpa [#allocation6], 0 }
   0x3   :  { %11 = vsyncpa [#allocation4], 0 }
   0x4   :  { %13 = vsyncpa [#allocation4 + $0x1], 0  ;;  %s495_s9 = smov 0   ;;  %s497_s10 = smov 0  }
   0x5   :  { %s499_s11 = smov 0   ;;  %s501_s12 = smov 0  }
   0x6 LB: > { %s516_s13 = sadd.s32 4294967295, %s477_s12   ;;  %s276_s14 = sadd.s32 4294967294, %s477_s12   ;;  %s477_s12 = sphi %s501_s12, %s645_s12   ;;  %s473_s11 = sphi %s499_s11, %s644_s11   ;;  %s469_s10 = sphi %s497_s10, %s643_s10   ;;  %s465_s9 = sphi %s495_s9, %s642_s9  }
   0x7   : > { %p39_p0 = scmp.ne.s32.totalorder %s469_s10, %s465_s9  ;;  %p40_p1 = scmp.eq.s32.totalorder %s516_s13, 0 }
   0x8   : > { %p84_p2 = scmp.eq.s32.totalorder %s516_s13, 1  ;;  %p90_p3 = scmp.eq.s32.totalorder %s276_s14, 1 }
   0x9   : > { %p525_p4 = por %p40_p1, %p39_p0  ;;  %p277_p5 = scmp.ge.s32.totalorder %s477_s12, 1 }
   0xa   : > { %p530_p6 = por %p90_p3, %p39_p0  ;;  %p97_p7 = scmp.lt.s32.totalorder %s477_s12, 3 }
   0xb   : > { %s109_s19 = sshll.u32 %s634_s1, 4  ;;  %s479_s21 = smov [#allocation5]   ;;  %s110_s19 = int_to_ptr.hbm [resolvable:$true] %s109_s19 }
   0xc   : > { %p538_p8 = pnand %p277_p5, %p97_p7  ;;  %s111_s22 = sshll.u32 %s479_s21, 4  ;;  %s112_s22 = int_to_ptr.vmem [resolvable:$true] %s111_s22 }
   0xd   : > { %s548_s23 = sadd.s32 1, %s477_s12   ;;  %s26_s24 = sadd.s32 1, %s473_s11 }
   0xe   : > { %p298_p10 = pneg %p538_p8  ;;  %s23_s25 = ssub.s32 %s477_s12, %s548_s23 }
   0xf   : > { %p24_p12 = scmp.eq.s32.totalorder %s23_s25, 0  ;;  %p33_p13 = scmp.ne.s32.totalorder %s473_s11, %s469_s10 }
  0x10   : > { %p299_p11 = pnand %p298_p10, %p40_p1  ;;  %p34_p0 = scmp.eq.s32.totalorder %s477_s12, 0 }
  0x11   : > { %s557_s26 = scalar_select %p24_p12, %s473_s11, %s26_s24  }
  0x12   : > { %301 = dma.hbm_to_vmem [thread:$0]  (!%p299_p11), %s110_s19, 32, %s112_s22, [#allocation6]  }
  0x13   : > { %p561_p3 = por %p84_p2, %p33_p13  ;;  %p311_p5 = scmp.lt.s32.totalorder %s477_s12, 2 }
  0x14   : > { %s122_s28 = sand.u32 1, %s473_s11   ;;  %s281_s29 = sshll.u32 %s477_s12, 1 }
  0x15   : > { %p35_p7 = por %p34_p0, %p33_p13  ;;  %s280_s30 = sshll.u32 %s122_s28, 1 }
  0x16   : > { %s130_s5 = scalar_lea.hbm %s633_s0, %s281_s29  ;;  %s126_s7 = scalar_lea.vmem [#allocation2], %s280_s30 }
  0x17   : > { %s132_s6 = sshll.u32 %s130_s5, 4  ;;  %s134_s8 = sshll.u32 %s126_s7, 4  ;;  %s133_s6 = int_to_ptr.hbm [resolvable:$true] %s132_s6  ;;  %s135_s8 = int_to_ptr.vmem [resolvable:$true] %s134_s8 }
  0x18   : > { %p571_p10 = pnand %p311_p5, %p35_p7  ;;  %s123_s17 = scalar_lea.sflag [#allocation3], %s122_s28 }
  0x19   : > { %s377_s18 = sshra.s32 %s133_s6, 4  ;;  %s384_s24 = scalar_lea.hbm %s633_s0, 4  ;;  %s378_s18 = int_to_ptr.hbm [resolvable:$true] %s377_s18 }
  0x1a   : > { %s379_s19 = scalar_lea.hbm %s378_s18, 2  ;;  %p381_p11 = pneg %p571_p10 }
  0x1b   : > { %p380_p2 = scmp.ne.s32.totalorder %s378_s18, %s379_s19  ;;  %p385_p0 = scmp.lt.s32.totalorder %s378_s18, %s633_s0 }
  0x1c   : > { %p386_p5 = scmp.lt.s32.totalorder %s384_s24, %s379_s19 }
  0x1d   : > { %p382_p12 = pnand %p381_p11, %p380_p2 }
  0x1e   : > { %p387_p7 = por %p386_p5, %p385_p0 }
  0x1f   : > { %p383_p13 = pneg %p382_p12 }
  0x21   : > { %p388_p9 = pnand %p387_p7, %p383_p13 }
  0x23   : > { %391 = shalt.err (!%p388_p9)
}
  0x24   : > { %305 = dma.hbm_to_vmem [thread:$0]  (!%p571_p10), %s133_s6, 32, %s135_s8, %s123_s17  }
  0x25   : > { %143 = sbr.rel (%p538_p8) target bundleno = 60 (0x3c), region = 28  ;;  %s588_s28 = sand.u32 (!%p538_p8), 1, %s469_s10  }
  0x26   : > { %s283_s30 = sshll.u32 (!%p538_p8), %s588_s28, 1  ;;  %s146_s3 = scalar_lea.sflag (!%p538_p8), [#allocation3], %s588_s28 }
  0x27   : > { %s149_s4 = scalar_lea.vmem (!%p538_p8), [#allocation2], %s283_s30 }
  0x2a   : > { %452 = dma.done.wait (%p525_p4), %s146_s3, 32  }
  0x2b   : > { %454 = vsyncadd (%p525_p4), %s146_s3, 4294967264 }
  0x2c   : > { %456 = dma.done.wait (%p40_p1), [#allocation6], 32  }
  0x2d   : > { %458 = vsyncadd (%p40_p1), [#allocation6], 4294967264  ;;  %s287_s20 = sshll.u32 %s516_s13, 1  ;;  %s175_s8 = scalar_lea.vmem [#allocation7], %s283_s30  ;;  %v176_v0 = vld [vmem:[%s149_s4] sm:$0x3] }
  0x2e   : > { %s191_s7 = scalar_lea.hbm %s635_s2, %s287_s20  ;;  %s193_s14 = sshll.u32 %s175_s8, 4  ;;  %v177_v1 = vld [vmem:[#allocation5] sm:$0x3]  ;;  %s194_s14 = int_to_ptr.vmem [resolvable:$true] %s193_s14 }
  0x2f   : > { %s195_s17 = sshll.u32 %s191_s7, 4  ;;  %v178_v2 = vadd.f32 %v177_v1, %v176_v0  ;;  %s181_s15 = scalar_lea.sflag [#allocation4], %s588_s28  ;;  %s196_s17 = int_to_ptr.hbm [resolvable:$true] %s195_s17 }
  0x30   : > { %s421_s18 = sshra.s32 %s196_s17, 4  ;;  %s427_s22 = scalar_lea.hbm %s635_s2, 4  ;;  %s422_s18 = int_to_ptr.hbm [resolvable:$true] %s421_s18 }
  0x31   : > { %179 = vst [vmem:[%s175_s8] sm:$0x3] %v178_v2  ;;  %s423_s19 = scalar_lea.hbm %s422_s18, 2  ;;  %p428_p9 = scmp.lt.s32.totalorder %s422_s18, %s635_s2 }
  0x32   : > { %p424_p1 = scmp.ne.s32.totalorder %s422_s18, %s423_s19  ;;  %p429_p10 = scmp.lt.s32.totalorder %s427_s22, %s423_s19 }
  0x34   : > { %p425_p4 = pnand %p424_p1, %p561_p3  ;;  %p430_p2 = por %p429_p10, %p428_p9 }
  0x36   : > { %p426_p8 = pneg %p425_p4 }
  0x38   : > { %p431_p11 = pnand %p430_p2, %p426_p8 }
  0x3a   : > { %434 = shalt.err (!%p431_p11)
}
  0x3b   : > { %296 = dma.vmem_to_hbm [thread:$0]  (%p561_p3), %s194_s14, 32, %s196_s17, %s181_s15  }
  0x3c PF: > { %s207_s29 = sand.u32 1, %s465_s9   ;;  %p641_p12 = scmp.ge.s32.totalorder %s477_s12, 2 }
  0x3d   : > { %s208_s28 = scalar_lea.sflag [#allocation4], %s207_s29 }
  0x3e   : > { %p307_p13 = pnand %p641_p12, %p530_p6 }
  0x40   : > { %p308_p0 = pneg %p307_p13 }
  0x42   : > { %460 = dma.done.wait (%p308_p0), %s208_s28, 32  }
  0x43   : > { %462 = vsyncadd (%p308_p0), %s208_s28, 4294967264  ;;  %p16_p5 = scmp.ge.s32.totalorder %s548_s23, 4   ;;  %s642_s9 = smov %s469_s10 }
  0x44   : > { %s643_s10 = smov %s473_s11  ;;  %s644_s11 = smov %s557_s26 }
  0x45   : > { %s645_s12 = smov %s548_s23  ;;  %18 = sbr.rel (!%p16_p5) target bundleno = 6 (0x6), region = 77 }
  0x4a   :  { %214 = vsyncpa [#allocation3], 1 }
  0x4b   :  { %216 = vsyncpa [#allocation3 + $0x1], 1 }
  0x4c   :  { %217 = vsyncpa [#allocation6], 1 }
  0x4d   :  { %218 = vsyncpa [#allocation4], 1 }
  0x4e   :  { %220 = vsyncpa [#allocation4 + $0x1], 1 }

</bundles_post_ra>
